<compile_context>
chip_gen: v5e
topology: v5e:2x2
jax: 0.10.0
libtpu: 0.0.40
codegen_flags: <defaults>
</compile_context>

<pallas_src>
from math import pi

import jax
import jax.numpy as jnp
from jax.experimental import pallas as pl
from jax.experimental.pallas import tpu as pltpu

_LANE = 128


# ----------------------------------------------------------------------------
# Kernel: one batch tile -> one lane-dense output slab
# ----------------------------------------------------------------------------
def _lpe_kernel(x_ref, w_ref, o_ref):
    x = x_ref[...]                                   # [TB, 1]
    w = w_ref[...]                                   # [1, half_dim]
    freqs = x * w * (2.0 * pi)                       # [TB, half_dim]  (VPU broadcast)

    # sin(freqs) ++ cos(freqs) as ONE contiguous EUP stream: cos(t) = sin(t + pi/2)
    theta = jnp.concatenate([freqs, freqs + (pi / 2.0)], axis=-1)   # [TB, 2*half_dim]
    sincos = jnp.sin(theta)                                          # [TB, 2*half_dim]

    out_dim = 1 + sincos.shape[-1]
    pad = o_ref.shape[-1] - out_dim
    pieces = [x, sincos]
    if pad > 0:
        pieces.append(jnp.zeros((x.shape[0], pad), dtype=x.dtype))
    slab = jnp.concatenate(pieces, axis=-1)          # [TB, padded_dim] lane-dense

    o_ref[...] = slab.astype(o_ref.dtype)            # single unmasked full store


# ----------------------------------------------------------------------------
# Wrapper
# ----------------------------------------------------------------------------
def learned_positional_embedding(x, weights, *, block_b=None):
    """x: [B] float, weights: [half_dim] float -> [B, 2*half_dim + 1] float32."""
    B = x.shape[0]
    half_dim = weights.shape[0]
    out_dim = 2 * half_dim + 1
    padded_dim = pl.cdiv(out_dim, _LANE) * _LANE     # lane-dense output width

    # Batch tile: multiple of 8 (sublane), capped so VMEM stays bounded at any B.
    if block_b is None:
        block_b = min(max(8, pl.cdiv(B, 8) * 8), 512)
    b_padded = pl.cdiv(B, block_b) * block_b

    x2 = x.reshape(B, 1).astype(jnp.float32)                 # 'b -> b 1'
    if b_padded != B:
        x2 = jnp.pad(x2, ((0, b_padded - B), (0, 0)))
    w2 = weights.reshape(1, half_dim).astype(jnp.float32)     # 'd -> 1 d'

    grid = (b_padded // block_b,)
    cost = pl.CostEstimate(
        flops=2 * b_padded * half_dim,
        transcendentals=b_padded * 2 * half_dim,
        bytes_accessed=4 * (b_padded + half_dim + b_padded * padded_dim),
    )

    out = pl.pallas_call(
        _lpe_kernel,
        out_shape=jax.ShapeDtypeStruct((b_padded, padded_dim), jnp.float32),
        grid_spec=pltpu.PrefetchScalarGridSpec(
            num_scalar_prefetch=0,
            grid=grid,
            in_specs=[
                pl.BlockSpec((block_b, 1), lambda i: (i, 0)),        # x tile
                pl.BlockSpec((1, half_dim), lambda i: (0, 0)),       # weights (replicated)
            ],
            out_specs=pl.BlockSpec((block_b, padded_dim), lambda i: (i, 0)),
        ),
        compiler_params=pltpu.CompilerParams(
            dimension_semantics=("parallel",),
        ),
        cost_estimate=cost,
    )(x2, w2)

    return out[:B, :out_dim]


# ----------------------------------------------------------------------------
# Pure-JAX reference (mirrors the PyTorch forward) for validation
# ----------------------------------------------------------------------------
def lpe_ref(x, weights):
    x2 = x[:, None].astype(jnp.float32)
    freqs = x2 * weights[None, :].astype(jnp.float32) * (2.0 * pi)
    fouriered = jnp.concatenate([jnp.sin(freqs), jnp.cos(freqs)], axis=-1)
    return jnp.concatenate([x2, fouriered], axis=-1)


# ----------------------------------------------------------------------------
if __name__ == "__main__":
    B = 8          # batch of continuous-time scalars
    dim = 32       # embedding dim (must be even)
    half_dim = dim // 2

    key = jax.random.PRNGKey(0)
    kx, kw = jax.random.split(key)
    x = jax.random.normal(kx, (B,), jnp.float32)               # continuous time values
    weights = jax.random.normal(kw, (half_dim,), jnp.float32)  # nn.Parameter(randn(half_dim))

    out = learned_positional_embedding(x, weights)
    out = jax.block_until_ready(out)
    assert out.shape == (B, dim + 1), out.shape

    ref = lpe_ref(x, weights)
    max_err = float(jnp.max(jnp.abs(out - ref)))
    assert max_err < 1e-4, f"mismatch vs reference: max_err={max_err}"

    print("KERNEL_OK")
</pallas_src>

<mosaic_0001>
module attributes {stable_mosaic.version = 11 : i64} {
  func.func @_lpe_kernel(%arg0: i32, %arg1: memref<8x1xf32, #tpu.memory_space<vmem>>, %arg2: memref<1x16xf32, #tpu.memory_space<vmem>>, %arg3: memref<8x128xf32, #tpu.memory_space<vmem>>) attributes {dimension_semantics = [#tpu.dimension_semantics<parallel>], iteration_bounds = array<i64: 1>, scalar_prefetch = 0 : i64, scratch_operands = 0 : i64, tpu.core_type = #tpu.core_type<tc>, window_params = [{transform_indices = @transform_0, window_bounds = array<i64: 8, 1>}, {pipeline_mode = #tpu.pipeline_mode<synchronous>, transform_indices = @transform_1, window_bounds = array<i64: 1, 16>}, {transform_indices = @transform_2, window_bounds = array<i64: 8, 128>}]} {
    %c0 = arith.constant 0 : index
    %c0_0 = arith.constant 0 : index
    %0 = vector.load %arg1[%c0, %c0_0] : memref<8x1xf32, #tpu.memory_space<vmem>>, vector<8x1xf32>
    %c0_1 = arith.constant 0 : index
    %c0_2 = arith.constant 0 : index
    %1 = vector.load %arg2[%c0_1, %c0_2] : memref<1x16xf32, #tpu.memory_space<vmem>>, vector<1x16xf32>
    %2 = vector.broadcast %0 : vector<8x1xf32> to vector<8x16xf32>
    %3 = vector.broadcast %1 : vector<1x16xf32> to vector<8x16xf32>
    %4 = arith.mulf %2, %3 : vector<8x16xf32>
    %cst = arith.constant 6.28318548 : f32
    %5 = vector.broadcast %cst : f32 to vector<8x16xf32>
    %6 = arith.mulf %4, %5 : vector<8x16xf32>
    %cst_3 = arith.constant 1.57079637 : f32
    %7 = vector.broadcast %cst_3 : f32 to vector<8x16xf32>
    %8 = arith.addf %6, %7 : vector<8x16xf32>
    %9 = tpu.concatenate %6, %8 in 1 : vector<8x16xf32>, vector<8x16xf32> -> vector<8x32xf32>
    %10 = math.sin %9 : vector<8x32xf32>
    %cst_4 = arith.constant 0.000000e+00 : f32
    %11 = vector.broadcast %cst_4 : f32 to vector<8x95xf32>
    %12 = tpu.concatenate %0, %10, %11 in 1 : vector<8x1xf32>, vector<8x32xf32>, vector<8x95xf32> -> vector<8x128xf32>
    %c0_5 = arith.constant 0 : index
    %c0_6 = arith.constant 0 : index
    %13 = vector.load %arg3[%c0_5, %c0_6] : memref<8x128xf32, #tpu.memory_space<vmem>>, vector<8x128xf32>
    tpu.vector_store %arg3[%c0_5, %c0_6], %12 {strides = array<i32>} : memref<8x128xf32, #tpu.memory_space<vmem>>, vector<8x128xf32>,
    return
  }
  func.func @transform_0(%arg0: i32) -> (i32, i32) {
    %c0_i32 = arith.constant 0 : i32
    %c0_i32_0 = arith.constant 0 : i32
    return %arg0, %c0_i32 : i32, i32
  }
  func.func @transform_1(%arg0: i32) -> (i32, i32) {
    %c0_i32 = arith.constant 0 : i32
    %c0_i32_0 = arith.constant 0 : i32
    %c0_i32_1 = arith.constant 0 : i32
    return %c0_i32, %c0_i32_0 : i32, i32
  }
  func.func @transform_2(%arg0: i32) -> (i32, i32) {
    %c0_i32 = arith.constant 0 : i32
    %c0_i32_0 = arith.constant 0 : i32
    return %arg0, %c0_i32 : i32, i32
  }
}

</mosaic_0001>

<bundles_post_ra>
// kernel: tpu_custom_call.1
= control target key start
LH: loop header
LB: loop body
LE: loop exit
PB: predicated region body
PF: predicated region fallthrough
CT: control target
= control target key end

     0   :  { %v252_v1 = vmov 0   ;;  %s351_s0 = inlined_call_operand.vmem [shape: f32[8,1], index: 0, kind: input, shape index: {}]   ;;  %s352_s1 = inlined_call_operand.vmem [shape: f32[1,16], index: 1, kind: input, shape index: {}]   ;;  %s353_s2 = inlined_call_operand.hbm [shape: f32[8,128], index: 2, kind: output, shape index: {}]  }
   0x1   :  { %v280_v0 = vld [vmem:[%s351_s0] sm:$0xff]  ;;  %224 = vset.pattern.permute.xlu0 %v252_v1 }
   0x2   :  { %7 = vsyncpa [#allocation3], 0  ;;  %16 = vperm.xlu0 %224, %v280_v0   ;;  %v225_v2 = vld [vmem:[%s352_s1] ss:$0 sm:$0xff]  ;;  %s253_s13 = smov 16   ;;  %vm29_vm0 = vcmask 130048  }
   0x3   :  { %v254_v20 = vmov 683565275   ;;  %v255_v22 = vmov 2475754826   ;;  %v256_v25 = vmov 2131351028  }
   0x4   :  { %v257_v28 = vmov 2102212464   ;;  %v258_v31 = vmov 920167782   ;;  %v259_v34 = vmov 1326507024  }
   0x5   :  { %s260_s0 = smov 1   ;;  %s261_s1 = smov [#allocation2]  }
   0x6   :  { %s200_s14 = sshll.u32 %s261_s1, 4  ;;  %s202_s17 = sshll.u32 %s353_s2, 4  ;;  %s201_s14 = int_to_ptr.vmem [resolvable:$true] %s200_s14  ;;  %s203_s17 = int_to_ptr.hbm [resolvable:$true] %s202_s17 }
  0x74   :  { %v17_v3 = vpop.permute.xlu0 %16 }
  0x75   :  { %v22_v4 = vmul.f32 %v225_v2, %v17_v3 }
  0x77   :  { %v23_v5 = vmul.f32 6.2831855, %v22_v4 }
  0x79   :  { %v24_v6 = vadd.f32 1.5707964, %v23_v5 }
  0x7b   :  { %26 = vrot.lane.b32.xlu0 %v24_v6, %s253_s13 }
  0xed   :  { %v27_v7 = vpop.permute.xlu0 %26 }
  0xee   :  { %v287_v8 = vsel %vm29_vm0, %v23_v5, %v27_v7 }
  0xef   :  { %v34_v9 = vand.u32 2139095040, %v287_v8  ;;  %v31_v12 = vand.u32 2147483647, %v287_v8  ;;  %vm33_vm13 = vcmp.lt.s32.totalorder %v287_v8, 0 }
  0xf1   :  { %v35_v10 = vshrl.u32 %v34_v9, 23  ;;  %v38_v14 = vand.u32 8388607, %v31_v12  ;;  %vm32_vm14 = vcmp.le.f32.partialorder %v31_v12, 0.7853982 }
  0xf3   :  { %v211_v11 = vadd.s32 4294967169, %v35_v10  ;;  %v39_v18 = vor.u32 8388608, %v38_v14 }
  0xf5   :  { %v41_v13 = vadd.s32 1, %v211_v11  ;;  %v304_v41 = vshll.u32 %v39_v18, 8 }
  0xf7   :  { %vm42_vm1 = vcmp.gt.s32.totalorder %v41_v13, 0  ;;  %v80_v50 = vand.u32 65535, %v304_v41  ;;  %v81_v51 = vshrl.u32 %v304_v41, 16 }
  0xf8   :  { %v43_v15 = vsel %vm42_vm1, %v41_v13, 0 }
  0xf9   :  { %v45_v16 = vand.u32 31, %v43_v15  ;;  %v295_v19 = vshrl.u32 %v43_v15, 5 }
  0xfb   :  { %v293_v17 = vsub.s32 32, %v45_v16  ;;  %v48_v21 = vshll.u32 %v254_v20, %v45_v16  ;;  %v51_v23 = vshll.u32 %v255_v22, %v45_v16  ;;  %v54_v27 = vshll.u32 %v256_v25, %v45_v16 }
  0xfc   :  { %v57_v30 = vshll.u32 %v257_v28, %v45_v16  ;;  %v60_v33 = vshll.u32 %v258_v31, %v45_v16  ;;  %vm63_vm2 = vcmp.lt.s32.totalorder %v295_v19, 1  ;;  %vm66_vm3 = vcmp.lt.s32.totalorder %v295_v19, 4 }
  0xfd   :  { %v49_v24 = vshrl.u32 %v255_v22, %v293_v17  ;;  %v52_v26 = vshrl.u32 %v256_v25, %v293_v17  ;;  %v55_v29 = vshrl.u32 %v257_v28, %v293_v17  ;;  %v58_v32 = vshrl.u32 %v258_v31, %v293_v17 }
  0xfe   :  { %v61_v35 = vshrl.u32 %v259_v34, %v293_v17  ;;  %vm65_vm4 = vcmp.lt.s32.totalorder %v295_v19, 3  ;;  %vm64_vm5 = vcmp.lt.s32.totalorder %v295_v19, 2  ;;  %v47_v16 = vshrl.u32 %v254_v20, %v293_v17 }
  0xff   :  { %v50_v36 = vor.u32 %v49_v24, %v48_v21  ;;  %v53_v37 = vor.u32 %v52_v26, %v51_v23  ;;  %v56_v38 = vor.u32 %v55_v29, %v54_v27  ;;  %v59_v39 = vor.u32 %v58_v32, %v57_v30 }
 0x100   :  { %v62_v40 = vor.u32 %v61_v35, %v60_v33 }
 0x101   :  { %v71_v42 = vsel %vm63_vm2, %v50_v36, %v53_v37  ;;  %v75_v43 = vsel %vm63_vm2, %v53_v37, %v56_v38  ;;  %v72_v44 = vsel %vm66_vm3, %v59_v39, 920167782  ;;  %v68_v13 = vsel %vm66_vm3, %v56_v38, 2102212464 }
 0x102   :  { %v76_v45 = vsel %vm66_vm3, %v62_v40, 1326507024  ;;  %v73_v46 = vsel %vm65_vm4, %v56_v38, %v72_v44  ;;  %v67_v25 = vsel %vm63_vm2, %v47_v16, %v50_v36  ;;  %v69_v26 = vsel %vm65_vm4, %v53_v37, %v68_v13 }
 0x103   :  { %v77_v47 = vsel %vm65_vm4, %v59_v39, %v76_v45  ;;  %v74_v48 = vsel %vm64_vm5, %v71_v42, %v73_v46  ;;  %v70_v17 = vsel %vm64_vm5, %v67_v25, %v69_v26  ;;  %vm174_vm2 = vweird.f32 %v287_v8 }
 0x104   :  { %v78_v49 = vsel %vm64_vm5, %v75_v43, %v77_v47  ;;  %v104_v54 = vand.u32 65535, %v74_v48  ;;  %v105_v55 = vshrl.u32 %v74_v48, 16  ;;  %v124_v33 = vmul.u32 %v304_v41, %v70_v17 }
 0x105   :  { %v82_v52 = vand.u32 65535, %v78_v49  ;;  %v83_v53 = vshrl.u32 %v78_v49, 16  ;;  %vm190_vm3 = vcmask 7168   ;;  %vm192_vm4 = vcmask 269312  }
 0x106   :  { %v107_v58 = vmul.u32 %v105_v55, %v80_v50  ;;  %v108_v59 = vmul.u32 %v104_v54, %v81_v51  ;;  %v106_v63 = vmul.u32 %v104_v54, %v80_v50  ;;  %v109_v5 = vmul.u32 %v105_v55, %v81_v51 }
 0x107   :  { %v85_v56 = vmul.u32 %v83_v53, %v80_v50  ;;  %v86_v57 = vmul.u32 %v82_v52, %v81_v51  ;;  %v84_v60 = vmul.u32 %v82_v52, %v80_v50  ;;  %v87_v62 = vmul.u32 %v83_v53, %v81_v51 }
 0x108   :  { %v110_v2 = vshll.u32 %v107_v58, 16  ;;  %v112_v7 = vshll.u32 %v108_v59, 16  ;;  %v111_v23 = vshrl.u32 %v107_v58, 16  ;;  %v113_v29 = vshrl.u32 %v108_v59, 16 }
 0x109   :  { %v88_v61 = vshll.u32 %v85_v56, 16  ;;  %v90_v3 = vshll.u32 %v86_v57, 16  ;;  %v89_v18 = vshrl.u32 %v85_v56, 16  ;;  %v91_v27 = vshrl.u32 %v86_v57, 16 }
 0x10a   :  { %vm114_vm7 = vc.u32 %v106_v63, %v110_v2  ;;  %v116_v9 = vadd.s32 %v110_v2, %v106_v63 }
 0x10b   :  { %vm92_vm6 = vc.u32 %v84_v60, %v88_v61  ;;  %v94_v4 = vadd.s32 %v88_v61, %v84_v60  ;;  %v115_v11 = vsel %vm114_vm7, 1, %v252_v1 }
 0x10c   :  { %v93_v6 = vsel %vm92_vm6, 1, %v252_v1  ;;  %v117_v15 = vadd.s32 %v115_v11, %v109_v5  ;;  %vm118_vm9 = vc.u32 %v116_v9, %v112_v7  ;;  %v120_v32 = vadd.s32 %v116_v9, %v112_v7 }
 0x10d   :  { %v95_v10 = vadd.s32 %v93_v6, %v87_v62  ;;  %vm96_vm8 = vc.u32 %v94_v4, %v90_v3  ;;  %v119_v22 = vsel %vm118_vm9, 1, %v252_v1 }
 0x10e   :  { %v97_v14 = vsel %vm96_vm8, 1, %v252_v1  ;;  %v121_v24 = vadd.s32 %v119_v22, %v117_v15 }
 0x10f   :  { %v99_v21 = vadd.s32 %v97_v14, %v95_v10 }
 0x110   :  { %v122_v30 = vadd.s32 %v121_v24, %v111_v23 }
 0x111   :  { %v100_v28 = vadd.s32 %v99_v21, %v89_v18 }
 0x112   :  { %v123_v20 = vadd.s32 %v122_v30, %v113_v29 }
 0x113   :  { %v101_v31 = vadd.s32 %v100_v28, %v91_v27 }
 0x114   :  { %v127_v1 = vadd.s32 1, %v123_v20 }
 0x115   :  { %vm126_vm10 = vc.u32 %v101_v31, %v120_v32  ;;  %v125_v19 = vadd.s32 %v120_v32, %v101_v31 }
 0x116   :  { %v128_v34 = vsel %vm126_vm10, %v127_v1, %v123_v20 }
 0x117   :  { %v129_v35 = vadd.s32 %v128_v34, %v124_v33 }
 0x119   :  { %v130_v36 = vadd.s32 536870912, %v129_v35 }
 0x11b   :  { %v131_v38 = vshrl.u32 %v130_v36, 30 }
 0x11d   :  { %v132_v39 = vshll.u32 %v131_v38, 30  ;;  %v155_v59 = vsub.s32 4, %v131_v38 }
 0x11f   :  { %v133_v37 = vsub.s32 %v129_v35, %v132_v39  ;;  %v156_v63 = vsel %vm33_vm13, %v155_v59, %v131_v38 }
 0x120   :  { %v158_v4 = vsel %vm32_vm14, 0, %v156_v63 }
 0x121   :  { %vm134_vm11 = vcmp.lt.s32.totalorder %v133_v37, 0  ;;  %v135_v40 = vsub.s32 0, %v133_v37  ;;  %v175_v10 = vadd.s32 3, %v158_v4 }
 0x123   :  { %v136_v42 = vsel %vm134_vm11, %v135_v40, %v133_v37  ;;  %v176_v15 = vand.u32 3, %v175_v10 }
 0x124   :  { %v137_v43 = vclz %v136_v42 }
 0x125   :  { %vm178_vm15 = vcmp.eq.s32.totalorder %v176_v15, 0  ;;  %vm181_vm0 = vcmp.eq.s32.totalorder %v176_v15, 2  ;;  %vm177_vm1 = vcmp.lt.s32.totalorder %v176_v15, 2 }
 0x126   :  { %v212_v44 = vadd.s32 4294967294, %v137_v43 }
 0x128   :  { %vm213_vm12 = vcmp.lt.s32.totalorder %v212_v44, 0 }
 0x129   :  { %v140_v45 = vsel %vm213_vm12, 0, %v212_v44 }
 0x12a   :  { %v141_v46 = vsub.s32 32, %v140_v45  ;;  %v145_v47 = vsub.s32 4294967266, %v140_v45  ;;  %v142_v48 = vshll.u32 %v133_v37, %v140_v45 }
 0x12c   :  { %v143_v49 = vshrl.u32 %v125_v19, %v141_v46  ;;  %v146_v50 = vadd.s32 127, %v145_v47 }
 0x12e   :  { %v144_v41 = vor.u32 %v143_v49, %v142_v48  ;;  %v147_v51 = vshll.u32 %v146_v50, 23 }
 0x130   :  { %v148_v52 = vor.u32 4788187, %v147_v51  ;;  %v151_v54 = vcvt.s32.f32 %v144_v41 }
 0x132   :  { %v149_v53 = vand.u32 2147483647, %v148_v52 }
 0x134   :  { %v152_v55 = vmul.f32 %v151_v54, %v149_v53 }
 0x136   :  { %v153_v56 = vxor.u32 2147483648, %v152_v55 }
 0x138   :  { %v154_v57 = vsel %vm33_vm13, %v153_v56, %v152_v55 }
 0x139   :  { %v157_v58 = vsel %vm32_vm14, %v287_v8, %v154_v57 }
 0x13a   :  { %v159_v60 = vmul.f32 %v157_v58, %v157_v58 }
 0x13c   :  { %v160_v61 = vmul.f32 -0.001358992, %v159_v60  ;;  %v167_v62 = vmul.f32 -0.00019511016, %v159_v60 }
 0x13e   :  { %v161_v2 = vadd.f32 0.041655596, %v160_v61  ;;  %v168_v3 = vadd.f32 0.008332121, %v167_v62 }
 0x140   :  { %v162_v5 = vmul.f32 %v161_v2, %v159_v60  ;;  %v169_v6 = vmul.f32 %v168_v3, %v159_v60 }
 0x142   :  { %v163_v7 = vadd.f32 -0.4999988, %v162_v5  ;;  %v170_v9 = vadd.f32 -0.16666654, %v169_v6 }
 0x144   :  { %v164_v11 = vmul.f32 %v163_v7, %v159_v60  ;;  %v171_v13 = vmul.f32 %v170_v9, %v159_v60 }
 0x146   :  { %v165_v14 = vadd.f32 1.0, %v164_v11  ;;  %v172_v12 = vadd.f32 1.0, %v171_v13 }
 0x148   :  { %v173_v16 = vmul.f32 %v172_v12, %v157_v58  ;;  %v182_v18 = vxor.u32 2147483648, %v165_v14 }
 0x14a   :  { %v179_v21 = vxor.u32 2147483648, %v173_v16  ;;  %v183_v23 = vsel %vm181_vm0, %v182_v18, %v173_v16 }
 0x14c   :  { %v180_v22 = vsel %vm178_vm15, %v165_v14, %v179_v21 }
 0x14d   :  { %v184_v24 = vsel %vm177_vm1, %v180_v22, %v183_v23 }
 0x14e   :  { %v185_v25 = vsel %vm174_vm2, nan, %v184_v24 }
 0x14f   :  { %187 = vrot.lane.b32.xlu1 %v185_v25, %s260_s0 }
 0x1c1   :  { %v188_v26 = vpop.permute.xlu1 %187 }
 0x1c2   :  { %v191_v27 = vsel %vm190_vm3, %v280_v0, %v188_v26 }
 0x1c3   :  { %v193_v28 = vsel %vm192_vm4, %v191_v27, 0.0 }
 0x1c4   :  { %194 = vst [vmem:[#allocation2] sm:$0xff] %v193_v28 }
 0x1c5   :  { %205 = dma.vmem_to_hbm [thread:$0]  %s201_s14, 128, %s203_s17, [#allocation3]  }
 0x1c6   :  { %250 = dma.done.wait [#allocation3], 128  }
 0x1c7   :  { %251 = vsyncadd [#allocation3], 4294967168 }
 0x1c8   :  { %210 = vsyncpa [#allocation3], 1 }

</bundles_post_ra>
